<compile_context>
chip_gen: v7x
topology: tpu7x:2x2x1
jax: 0.10.0
libtpu: 0.0.40
codegen_flags: <defaults>
</compile_context>

<pallas_src>
import jax
import jax.numpy as jnp
from jax.experimental import pallas as pl
from jax.experimental.pallas import tpu as pltpu

N_GMM = 2
LATENT_DIM = 3
INPUT_SIZE = 118
F_PAD = 128                       # feature dim padded to a full lane width
ZG_W = 8                          # packed [z(3) | gamma(2) | pad(3)] output width
BATCH = 8
MAX_TILE_N = 1024                 # rows per grid step for large batches
EPS_COS = 1e-8


def _round_up(n, m):
    return ((n + m - 1) // m) * m


def dagmm_kernel(
    x_ref,                                       # (TILE_N, F_PAD), cols >=118 are zero
    ew0, eb0, ew1, eb1, ew2, eb2, ew3, eb3,      # encoder params (ew0 row-padded to 128)
    dw0, db0, dw1, db1, dw2, db2, dw3, db3,      # decoder params (dw3/db3 col-padded to 128)
    sw0, sb0, sw1, sb1,                          # estimation params
    dec_ref,                                     # (TILE_N, F_PAD)
    zg_ref,                                      # (TILE_N, ZG_W) = [enc|rec_eu|rec_cos|gamma|0]
):
    x = x_ref[...]

    def lin(h, w_ref, b_ref):
        return jnp.dot(h, w_ref[...], preferred_element_type=jnp.float32) + b_ref[...]

    # ---- encoder ----
    h = jnp.tanh(lin(x, ew0, eb0))
    h = jnp.tanh(lin(h, ew1, eb1))
    h = jnp.tanh(lin(h, ew2, eb2))
    enc = lin(h, ew3, eb3)                       # (TILE_N, 1)

    # ---- decoder ----
    h = jnp.tanh(lin(enc, dw0, db0))
    h = jnp.tanh(lin(h, dw1, db1))
    h = jnp.tanh(lin(h, dw2, db2))
    dec = lin(h, dw3, db3)                       # (TILE_N, F_PAD); pad lanes are exactly 0
    dec_ref[...] = dec                           # single lane-dense store

    # ---- reconstruction features (pad lanes are zero => sums unaffected) ----
    dot_xd = jnp.sum(x * dec, axis=1, keepdims=True)
    norm_x = jnp.sqrt(jnp.sum(x * x, axis=1, keepdims=True))
    norm_d = jnp.sqrt(jnp.sum(dec * dec, axis=1, keepdims=True))
    rec_cosine = dot_xd / jnp.maximum(norm_x * norm_d, EPS_COS)
    diff = x - dec
    # NOTE: matches PyTorch reference exactly (no epsilon on norm_x).
    rec_euclidean = jnp.sqrt(jnp.sum(diff * diff, axis=1, keepdims=True)) / norm_x

    # ---- pack z into the consolidated output block ----
    zg_ref[:, 0:1] = enc
    zg_ref[:, 1:2] = rec_euclidean
    zg_ref[:, 2:3] = rec_cosine
    zg_ref[:, LATENT_DIM + N_GMM:] = jnp.zeros(
        (x.shape[0], ZG_W - LATENT_DIM - N_GMM), jnp.float32)

    # ---- estimation net ----
    # Read z back from the packed VMEM output block and run a real MXU matmul.
    z = zg_ref[:, 0:LATENT_DIM]                                  # (TILE_N, 3)
    h_est = jnp.tanh(jnp.dot(z, sw0[...], preferred_element_type=jnp.float32) + sb0[...])
    # TODO(synk): Dropout(p=0.5) is identity here (eval mode); train-mode PyTorch differs.
    logits = jnp.dot(h_est, sw1[...], preferred_element_type=jnp.float32) + sb1[...]
    m = jnp.max(logits, axis=1, keepdims=True)
    e = jnp.exp(logits - m)
    gamma = e * pl.reciprocal(jnp.sum(e, axis=1, keepdims=True), approx=False)
    zg_ref[:, LATENT_DIM:LATENT_DIM + N_GMM] = gamma


def make_params(key):
    """Deterministic synthetic parameters; shapes match DaGMM.__init__."""
    enc_dims = [(INPUT_SIZE, 60), (60, 30), (30, 10), (10, 1)]
    dec_dims = [(1, 10), (10, 30), (30, 60), (60, INPUT_SIZE)]
    est_dims = [(LATENT_DIM, 10), (10, N_GMM)]
    params = []
    for (fan_in, fan_out) in enc_dims + dec_dims + est_dims:
        key, kw, kb = jax.random.split(key, 3)
        w = jax.random.normal(kw, (fan_in, fan_out), jnp.float32) * 0.1
        b = jax.random.normal(kb, (1, fan_out), jnp.float32) * 0.01
        params.append(w)
        params.append(b)
    return params


def dagmm_forward(x, params, max_tile=MAX_TILE_N):
    (ew0, eb0, ew1, eb1, ew2, eb2, ew3, eb3,
     dw0, db0, dw1, db1, dw2, db2, dw3, db3,
     sw0, sb0, sw1, sb1) = params

    n, f = x.shape
    assert f == INPUT_SIZE

    # Batch tiling: TILE_N multiple of 8; rows padded with zeros to a whole number
    # of tiles (padded rows are sliced off after the call).
    tile = min(max_tile, _round_up(n, 8))
    n_pad = _round_up(n, tile)

    # Lane padding 118 -> 128 with exact zeros (does not change any result).
    x_p = jnp.zeros((n_pad, F_PAD), jnp.float32).at[:n, :f].set(x)
    ew0_p = jnp.zeros((F_PAD, ew0.shape[1]), jnp.float32).at[:f, :].set(ew0)
    dw3_p = jnp.zeros((dw3.shape[0], F_PAD), jnp.float32).at[:, :f].set(dw3)
    db3_p = jnp.zeros((1, F_PAD), jnp.float32).at[:, :f].set(db3)

    kparams = (ew0_p, eb0, ew1, eb1, ew2, eb2, ew3, eb3,
               dw0, db0, dw1, db1, dw2, db2, dw3_p, db3_p,
               sw0, sb0, sw1, sb1)

    grid = (n_pad // tile,)
    x_spec = pl.BlockSpec((tile, F_PAD), lambda i: (i, 0))
    # Weights/biases: full-array blocks, constant index_map -> resident in VMEM.
    w_specs = [pl.BlockSpec(p.shape, lambda i: (0, 0)) for p in kparams]

    out_shapes = (
        jax.ShapeDtypeStruct((n_pad, F_PAD), jnp.float32),   # dec (lane-padded)
        jax.ShapeDtypeStruct((n_pad, ZG_W), jnp.float32),    # [z | gamma | pad]
    )
    out_specs = [
        pl.BlockSpec((tile, F_PAD), lambda i: (i, 0)),
        pl.BlockSpec((tile, ZG_W), lambda i: (i, 0)),
    ]

    # Advisory cost estimate for the XLA scheduler.
    per_row_flops = 2 * (118 * 60 + 60 * 30 + 30 * 10 + 10 * 1
                         + 1 * 10 + 10 * 30 + 30 * 60 + 60 * 118
                         + LATENT_DIM * 10 + 10 * N_GMM)
    per_row_trans = 210 + N_GMM                               # tanh + exp
    param_bytes = sum(int(p.size) * 4 for p in kparams)
    bytes_accessed = n_pad * (F_PAD + F_PAD + ZG_W) * 4 + param_bytes

    fn = pl.pallas_call(
        dagmm_kernel,
        out_shape=out_shapes,
        grid_spec=pltpu.PrefetchScalarGridSpec(
            num_scalar_prefetch=0,
            grid=grid,
            in_specs=[x_spec] + w_specs,
            out_specs=out_specs,
        ),
        compiler_params=pltpu.CompilerParams(
            dimension_semantics=("parallel",),
        ),
        cost_estimate=pl.CostEstimate(
            flops=per_row_flops * n_pad,
            transcendentals=per_row_trans * n_pad,
            bytes_accessed=bytes_accessed,
        ),
    )
    dec_p, zg = fn(x_p, *kparams)

    dec = dec_p[:n, :INPUT_SIZE]
    enc = zg[:n, 0:1]
    z = zg[:n, 0:LATENT_DIM]
    gamma = zg[:n, LATENT_DIM:LATENT_DIM + N_GMM]
    return enc, dec, z, gamma


def dagmm_forward_ref(x, params):
    """Plain-JAX reference mirroring the PyTorch forward (eval mode)."""
    (ew0, eb0, ew1, eb1, ew2, eb2, ew3, eb3,
     dw0, db0, dw1, db1, dw2, db2, dw3, db3,
     sw0, sb0, sw1, sb1) = params
    h = jnp.tanh(x @ ew0 + eb0)
    h = jnp.tanh(h @ ew1 + eb1)
    h = jnp.tanh(h @ ew2 + eb2)
    enc = h @ ew3 + eb3
    h = jnp.tanh(enc @ dw0 + db0)
    h = jnp.tanh(h @ dw1 + db1)
    h = jnp.tanh(h @ dw2 + db2)
    dec = h @ dw3 + db3
    norm_x = jnp.linalg.norm(x, axis=1, keepdims=True)
    norm_d = jnp.linalg.norm(dec, axis=1, keepdims=True)
    cos = jnp.sum(x * dec, axis=1, keepdims=True) / jnp.maximum(norm_x * norm_d, EPS_COS)
    rel = jnp.linalg.norm(x - dec, axis=1, keepdims=True) / norm_x
    z = jnp.concatenate([enc, rel, cos], axis=1)
    h = jnp.tanh(z @ sw0 + sb0)
    logits = h @ sw1 + sb1
    gamma = jax.nn.softmax(logits, axis=1)
    return enc, dec, z, gamma


if __name__ == "__main__":
    key = jax.random.PRNGKey(0)
    key, kx = jax.random.split(key)
    x = jax.random.normal(kx, (BATCH, INPUT_SIZE), jnp.float32)
    params = make_params(key)

    enc, dec, z, gamma = dagmm_forward(x, params)
    jax.block_until_ready((enc, dec, z, gamma))

    enc_r, dec_r, z_r, gamma_r = dagmm_forward_ref(x, params)
    ok = True
    for a, b in [(enc, enc_r), (dec, dec_r), (z, z_r), (gamma, gamma_r)]:
        ok = ok and bool(jnp.allclose(a, b, rtol=1e-2, atol=1e-2))
    assert ok, "Pallas kernel output mismatch vs JAX reference"
    print("KERNEL_OK")
</pallas_src>

<mosaic_0001>
module attributes {stable_mosaic.version = 11 : i64} {
  func.func @dagmm_kernel(%arg0: i32, %arg1: memref<8x128xf32, #tpu.memory_space<vmem>>, %arg2: memref<128x60xf32, #tpu.memory_space<vmem>>, %arg3: memref<1x60xf32, #tpu.memory_space<vmem>>, %arg4: memref<60x30xf32, #tpu.memory_space<vmem>>, %arg5: memref<1x30xf32, #tpu.memory_space<vmem>>, %arg6: memref<30x10xf32, #tpu.memory_space<vmem>>, %arg7: memref<1x10xf32, #tpu.memory_space<vmem>>, %arg8: memref<10x1xf32, #tpu.memory_space<vmem>>, %arg9: memref<1x1xf32, #tpu.memory_space<vmem>>, %arg10: memref<1x10xf32, #tpu.memory_space<vmem>>, %arg11: memref<1x10xf32, #tpu.memory_space<vmem>>, %arg12: memref<10x30xf32, #tpu.memory_space<vmem>>, %arg13: memref<1x30xf32, #tpu.memory_space<vmem>>, %arg14: memref<30x60xf32, #tpu.memory_space<vmem>>, %arg15: memref<1x60xf32, #tpu.memory_space<vmem>>, %arg16: memref<60x128xf32, #tpu.memory_space<vmem>>, %arg17: memref<1x128xf32, #tpu.memory_space<vmem>>, %arg18: memref<3x10xf32, #tpu.memory_space<vmem>>, %arg19: memref<1x10xf32, #tpu.memory_space<vmem>>, %arg20: memref<10x2xf32, #tpu.memory_space<vmem>>, %arg21: memref<1x2xf32, #tpu.memory_space<vmem>>, %arg22: memref<8x128xf32, #tpu.memory_space<vmem>>, %arg23: memref<8x8xf32, #tpu.memory_space<vmem>>) attributes {dimension_semantics = [#tpu.dimension_semantics<parallel>], iteration_bounds = array<i64: 1>, scalar_prefetch = 0 : i64, scratch_operands = 0 : i64, tpu.core_type = #tpu.core_type<tc>, window_params = [{transform_indices = @transform_0, window_bounds = array<i64: 8, 128>}, {pipeline_mode = #tpu.pipeline_mode<synchronous>, transform_indices = @transform_1, window_bounds = array<i64: 128, 60>}, {pipeline_mode = #tpu.pipeline_mode<synchronous>, transform_indices = @transform_2, window_bounds = array<i64: 1, 60>}, {pipeline_mode = #tpu.pipeline_mode<synchronous>, transform_indices = @transform_3, window_bounds = array<i64: 60, 30>}, {pipeline_mode = #tpu.pipeline_mode<synchronous>, transform_indices = @transform_4, window_bounds = array<i64: 1, 30>}, {pipeline_mode = #tpu.pipeline_mode<synchronous>, transform_indices = @transform_5, window_bounds = array<i64: 30, 10>}, {pipeline_mode = #tpu.pipeline_mode<synchronous>, transform_indices = @transform_6, window_bounds = array<i64: 1, 10>}, {pipeline_mode = #tpu.pipeline_mode<synchronous>, transform_indices = @transform_7, window_bounds = array<i64: 10, 1>}, {pipeline_mode = #tpu.pipeline_mode<synchronous>, transform_indices = @transform_8, window_bounds = array<i64: 1, 1>}, {pipeline_mode = #tpu.pipeline_mode<synchronous>, transform_indices = @transform_9, window_bounds = array<i64: 1, 10>}, {pipeline_mode = #tpu.pipeline_mode<synchronous>, transform_indices = @transform_10, window_bounds = array<i64: 1, 10>}, {pipeline_mode = #tpu.pipeline_mode<synchronous>, transform_indices = @transform_11, window_bounds = array<i64: 10, 30>}, {pipeline_mode = #tpu.pipeline_mode<synchronous>, transform_indices = @transform_12, window_bounds = array<i64: 1, 30>}, {pipeline_mode = #tpu.pipeline_mode<synchronous>, transform_indices = @transform_13, window_bounds = array<i64: 30, 60>}, {pipeline_mode = #tpu.pipeline_mode<synchronous>, transform_indices = @transform_14, window_bounds = array<i64: 1, 60>}, {pipeline_mode = #tpu.pipeline_mode<synchronous>, transform_indices = @transform_15, window_bounds = array<i64: 60, 128>}, {pipeline_mode = #tpu.pipeline_mode<synchronous>, transform_indices = @transform_16, window_bounds = array<i64: 1, 128>}, {pipeline_mode = #tpu.pipeline_mode<synchronous>, transform_indices = @transform_17, window_bounds = array<i64: 3, 10>}, {pipeline_mode = #tpu.pipeline_mode<synchronous>, transform_indices = @transform_18, window_bounds = array<i64: 1, 10>}, {pipeline_mode = #tpu.pipeline_mode<synchronous>, transform_indices = @transform_19, window_bounds = array<i64: 10, 2>}, {pipeline_mode = #tpu.pipeline_mode<synchronous>, transform_indices = @transform_20, window_bounds = array<i64: 1, 2>}, {transform_indices = @transform_21, window_bounds = array<i64: 8, 128>}, {transform_indices = @transform_22, window_bounds = array<i64: 8, 8>}]} {
    %c0 = arith.constant 0 : index
    %c0_0 = arith.constant 0 : index
    %0 = vector.load %arg1[%c0, %c0_0] : memref<8x128xf32, #tpu.memory_space<vmem>>, vector<8x128xf32>
    %c0_1 = arith.constant 0 : index
    %c0_2 = arith.constant 0 : index
    %1 = vector.load %arg2[%c0_1, %c0_2] : memref<128x60xf32, #tpu.memory_space<vmem>>, vector<128x60xf32>
    %cst = arith.constant dense<0.000000e+00> : vector<8x60xf32>
    %2 = tpu.matmul %0, %1, %cst {dimension_numbers = #tpu.dot_dimension_numbers<[1], [0], [0], [1], [0, 0, 1, 1], [], []>} : vector<8x128xf32>, vector<128x60xf32>, vector<8x60xf32> -> vector<8x60xf32>
    %c0_3 = arith.constant 0 : index
    %c0_4 = arith.constant 0 : index
    %3 = vector.load %arg3[%c0_3, %c0_4] : memref<1x60xf32, #tpu.memory_space<vmem>>, vector<1x60xf32>
    %4 = vector.broadcast %3 : vector<1x60xf32> to vector<8x60xf32>
    %5 = arith.addf %2, %4 : vector<8x60xf32>
    %6 = math.tanh %5 : vector<8x60xf32>
    %c0_5 = arith.constant 0 : index
    %c0_6 = arith.constant 0 : index
    %7 = vector.load %arg4[%c0_5, %c0_6] : memref<60x30xf32, #tpu.memory_space<vmem>>, vector<60x30xf32>
    %cst_7 = arith.constant dense<0.000000e+00> : vector<8x30xf32>
    %8 = tpu.matmul %6, %7, %cst_7 {dimension_numbers = #tpu.dot_dimension_numbers<[1], [0], [0], [1], [0, 0, 1, 1], [], []>} : vector<8x60xf32>, vector<60x30xf32>, vector<8x30xf32> -> vector<8x30xf32>
    %c0_8 = arith.constant 0 : index
    %c0_9 = arith.constant 0 : index
    %9 = vector.load %arg5[%c0_8, %c0_9] : memref<1x30xf32, #tpu.memory_space<vmem>>, vector<1x30xf32>
    %10 = vector.broadcast %9 : vector<1x30xf32> to vector<8x30xf32>
    %11 = arith.addf %8, %10 : vector<8x30xf32>
    %12 = math.tanh %11 : vector<8x30xf32>
    %c0_10 = arith.constant 0 : index
    %c0_11 = arith.constant 0 : index
    %13 = vector.load %arg6[%c0_10, %c0_11] : memref<30x10xf32, #tpu.memory_space<vmem>>, vector<30x10xf32>
    %cst_12 = arith.constant dense<0.000000e+00> : vector<8x10xf32>
    %14 = tpu.matmul %12, %13, %cst_12 {dimension_numbers = #tpu.dot_dimension_numbers<[1], [0], [0], [1], [0, 0, 1, 1], [], []>} : vector<8x30xf32>, vector<30x10xf32>, vector<8x10xf32> -> vector<8x10xf32>
    %c0_13 = arith.constant 0 : index
    %c0_14 = arith.constant 0 : index
    %15 = vector.load %arg7[%c0_13, %c0_14] : memref<1x10xf32, #tpu.memory_space<vmem>>, vector<1x10xf32>
    %16 = vector.broadcast %15 : vector<1x10xf32> to vector<8x10xf32>
    %17 = arith.addf %14, %16 : vector<8x10xf32>
    %18 = math.tanh %17 : vector<8x10xf32>
    %c0_15 = arith.constant 0 : index
    %c0_16 = arith.constant 0 : index
    %19 = vector.load %arg8[%c0_15, %c0_16] : memref<10x1xf32, #tpu.memory_space<vmem>>, vector<10x1xf32>
    %cst_17 = arith.constant dense<0.000000e+00> : vector<8x1xf32>
    %20 = tpu.matmul %18, %19, %cst_17 {dimension_numbers = #tpu.dot_dimension_numbers<[1], [0], [0], [1], [0, 0, 1, 1], [], []>} : vector<8x10xf32>, vector<10x1xf32>, vector<8x1xf32> -> vector<8x1xf32>
    %c0_18 = arith.constant 0 : index
    %c0_19 = arith.constant 0 : index
    %21 = vector.load %arg9[%c0_18, %c0_19] : memref<1x1xf32, #tpu.memory_space<vmem>>, vector<1x1xf32>
    %22 = vector.broadcast %21 : vector<1x1xf32> to vector<8x1xf32>
    %23 = arith.addf %20, %22 : vector<8x1xf32>
    %c0_20 = arith.constant 0 : index
    %c0_21 = arith.constant 0 : index
    %24 = vector.load %arg10[%c0_20, %c0_21] : memref<1x10xf32, #tpu.memory_space<vmem>>, vector<1x10xf32>
    %cst_22 = arith.constant dense<0.000000e+00> : vector<8x10xf32>
    %25 = tpu.matmul %23, %24, %cst_22 {dimension_numbers = #tpu.dot_dimension_numbers<[1], [0], [0], [1], [0, 0, 1, 1], [], []>} : vector<8x1xf32>, vector<1x10xf32>, vector<8x10xf32> -> vector<8x10xf32>
    %c0_23 = arith.constant 0 : index
    %c0_24 = arith.constant 0 : index
    %26 = vector.load %arg11[%c0_23, %c0_24] : memref<1x10xf32, #tpu.memory_space<vmem>>, vector<1x10xf32>
    %27 = vector.broadcast %26 : vector<1x10xf32> to vector<8x10xf32>
    %28 = arith.addf %25, %27 : vector<8x10xf32>
    %29 = math.tanh %28 : vector<8x10xf32>
    %c0_25 = arith.constant 0 : index
    %c0_26 = arith.constant 0 : index
    %30 = vector.load %arg12[%c0_25, %c0_26] : memref<10x30xf32, #tpu.memory_space<vmem>>, vector<10x30xf32>
    %cst_27 = arith.constant dense<0.000000e+00> : vector<8x30xf32>
    %31 = tpu.matmul %29, %30, %cst_27 {dimension_numbers = #tpu.dot_dimension_numbers<[1], [0], [0], [1], [0, 0, 1, 1], [], []>} : vector<8x10xf32>, vector<10x30xf32>, vector<8x30xf32> -> vector<8x30xf32>
    %c0_28 = arith.constant 0 : index
    %c0_29 = arith.constant 0 : index
    %32 = vector.load %arg13[%c0_28, %c0_29] : memref<1x30xf32, #tpu.memory_space<vmem>>, vector<1x30xf32>
    %33 = vector.broadcast %32 : vector<1x30xf32> to vector<8x30xf32>
    %34 = arith.addf %31, %33 : vector<8x30xf32>
    %35 = math.tanh %34 : vector<8x30xf32>
    %c0_30 = arith.constant 0 : index
    %c0_31 = arith.constant 0 : index
    %36 = vector.load %arg14[%c0_30, %c0_31] : memref<30x60xf32, #tpu.memory_space<vmem>>, vector<30x60xf32>
    %cst_32 = arith.constant dense<0.000000e+00> : vector<8x60xf32>
    %37 = tpu.matmul %35, %36, %cst_32 {dimension_numbers = #tpu.dot_dimension_numbers<[1], [0], [0], [1], [0, 0, 1, 1], [], []>} : vector<8x30xf32>, vector<30x60xf32>, vector<8x60xf32> -> vector<8x60xf32>
    %c0_33 = arith.constant 0 : index
    %c0_34 = arith.constant 0 : index
    %38 = vector.load %arg15[%c0_33, %c0_34] : memref<1x60xf32, #tpu.memory_space<vmem>>, vector<1x60xf32>
    %39 = vector.broadcast %38 : vector<1x60xf32> to vector<8x60xf32>
    %40 = arith.addf %37, %39 : vector<8x60xf32>
    %41 = math.tanh %40 : vector<8x60xf32>
    %c0_35 = arith.constant 0 : index
    %c0_36 = arith.constant 0 : index
    %42 = vector.load %arg16[%c0_35, %c0_36] : memref<60x128xf32, #tpu.memory_space<vmem>>, vector<60x128xf32>
    %cst_37 = arith.constant dense<0.000000e+00> : vector<8x128xf32>
    %43 = tpu.matmul %41, %42, %cst_37 {dimension_numbers = #tpu.dot_dimension_numbers<[1], [0], [0], [1], [0, 0, 1, 1], [], []>} : vector<8x60xf32>, vector<60x128xf32>, vector<8x128xf32> -> vector<8x128xf32>
    %c0_38 = arith.constant 0 : index
    %c0_39 = arith.constant 0 : index
    %44 = vector.load %arg17[%c0_38, %c0_39] : memref<1x128xf32, #tpu.memory_space<vmem>>, vector<1x128xf32>
    %45 = vector.broadcast %44 : vector<1x128xf32> to vector<8x128xf32>
    %46 = arith.addf %43, %45 : vector<8x128xf32>
    %c0_40 = arith.constant 0 : index
    %c0_41 = arith.constant 0 : index
    %47 = vector.load %arg22[%c0_40, %c0_41] : memref<8x128xf32, #tpu.memory_space<vmem>>, vector<8x128xf32>
    tpu.vector_store %arg22[%c0_40, %c0_41], %46 {strides = array<i32>} : memref<8x128xf32, #tpu.memory_space<vmem>>, vector<8x128xf32>,
    %48 = arith.mulf %0, %46 : vector<8x128xf32>
    %cst_42 = arith.constant dense<0.000000e+00> : vector<8xf32>
    %49 = vector.multi_reduction <add>, %48, %cst_42 [1] : vector<8x128xf32> to vector<8xf32>
    %50 = vector.shape_cast %49 : vector<8xf32> to vector<8x1xf32>
    %51 = arith.mulf %0, %0 : vector<8x128xf32>
    %cst_43 = arith.constant dense<0.000000e+00> : vector<8xf32>
    %52 = vector.multi_reduction <add>, %51, %cst_43 [1] : vector<8x128xf32> to vector<8xf32>
    %53 = vector.shape_cast %52 : vector<8xf32> to vector<8x1xf32>
    %54 = math.sqrt %53 : vector<8x1xf32>
    %55 = arith.mulf %46, %46 : vector<8x128xf32>
    %cst_44 = arith.constant dense<0.000000e+00> : vector<8xf32>
    %56 = vector.multi_reduction <add>, %55, %cst_44 [1] : vector<8x128xf32> to vector<8xf32>
    %57 = vector.shape_cast %56 : vector<8xf32> to vector<8x1xf32>
    %58 = math.sqrt %57 : vector<8x1xf32>
    %59 = arith.mulf %54, %58 : vector<8x1xf32>
    %cst_45 = arith.constant 9.99999993E-9 : f32
    %60 = vector.broadcast %cst_45 : f32 to vector<8x1xf32>
    %61 = arith.maximumf %59, %60 : vector<8x1xf32>
    %62 = arith.divf %50, %61 : vector<8x1xf32>
    %63 = arith.subf %0, %46 : vector<8x128xf32>
    %64 = arith.mulf %63, %63 : vector<8x128xf32>
    %cst_46 = arith.constant dense<0.000000e+00> : vector<8xf32>
    %65 = vector.multi_reduction <add>, %64, %cst_46 [1] : vector<8x128xf32> to vector<8xf32>
    %66 = vector.shape_cast %65 : vector<8xf32> to vector<8x1xf32>
    %67 = math.sqrt %66 : vector<8x1xf32>
    %68 = arith.divf %67, %54 : vector<8x1xf32>
    %c0_47 = arith.constant 0 : index
    %c0_48 = arith.constant 0 : index
    %69 = vector.load %arg23[%c0_47, %c0_48] : memref<8x8xf32, #tpu.memory_space<vmem>>, vector<8x1xf32>
    tpu.vector_store %arg23[%c0_47, %c0_48], %23 {strides = array<i32>} : memref<8x8xf32, #tpu.memory_space<vmem>>, vector<8x1xf32>,
    %c0_49 = arith.constant 0 : index
    %c1 = arith.constant 1 : index
    %70 = vector.load %arg23[%c0_49, %c1] : memref<8x8xf32, #tpu.memory_space<vmem>>, vector<8x1xf32>
    tpu.vector_store %arg23[%c0_49, %c1], %68 {strides = array<i32>} : memref<8x8xf32, #tpu.memory_space<vmem>>, vector<8x1xf32>,
    %c0_50 = arith.constant 0 : index
    %c2 = arith.constant 2 : index
    %71 = vector.load %arg23[%c0_50, %c2] : memref<8x8xf32, #tpu.memory_space<vmem>>, vector<8x1xf32>
    tpu.vector_store %arg23[%c0_50, %c2], %62 {strides = array<i32>} : memref<8x8xf32, #tpu.memory_space<vmem>>, vector<8x1xf32>,
    %cst_51 = arith.constant 0.000000e+00 : f32
    %72 = vector.broadcast %cst_51 : f32 to vector<8x3xf32>
    %c0_52 = arith.constant 0 : index
    %c5 = arith.constant 5 : index
    %73 = vector.load %arg23[%c0_52, %c5] : memref<8x8xf32, #tpu.memory_space<vmem>>, vector<8x3xf32>
    tpu.vector_store %arg23[%c0_52, %c5], %72 {strides = array<i32>} : memref<8x8xf32, #tpu.memory_space<vmem>>, vector<8x3xf32>,
    %c0_53 = arith.constant 0 : index
    %c0_54 = arith.constant 0 : index
    %74 = vector.load %arg23[%c0_53, %c0_54] : memref<8x8xf32, #tpu.memory_space<vmem>>, vector<8x3xf32>
    %c0_55 = arith.constant 0 : index
    %c0_56 = arith.constant 0 : index
    %75 = vector.load %arg18[%c0_55, %c0_56] : memref<3x10xf32, #tpu.memory_space<vmem>>, vector<3x10xf32>
    %cst_57 = arith.constant dense<0.000000e+00> : vector<8x10xf32>
    %76 = tpu.matmul %74, %75, %cst_57 {dimension_numbers = #tpu.dot_dimension_numbers<[1], [0], [0], [1], [0, 0, 1, 1], [], []>} : vector<8x3xf32>, vector<3x10xf32>, vector<8x10xf32> -> vector<8x10xf32>
    %c0_58 = arith.constant 0 : index
    %c0_59 = arith.constant 0 : index
    %77 = vector.load %arg19[%c0_58, %c0_59] : memref<1x10xf32, #tpu.memory_space<vmem>>, vector<1x10xf32>
    %78 = vector.broadcast %77 : vector<1x10xf32> to vector<8x10xf32>
    %79 = arith.addf %76, %78 : vector<8x10xf32>
    %80 = math.tanh %79 : vector<8x10xf32>
    %c0_60 = arith.constant 0 : index
    %c0_61 = arith.constant 0 : index
    %81 = vector.load %arg20[%c0_60, %c0_61] : memref<10x2xf32, #tpu.memory_space<vmem>>, vector<10x2xf32>
    %cst_62 = arith.constant dense<0.000000e+00> : vector<8x2xf32>
    %82 = tpu.matmul %80, %81, %cst_62 {dimension_numbers = #tpu.dot_dimension_numbers<[1], [0], [0], [1], [0, 0, 1, 1], [], []>} : vector<8x10xf32>, vector<10x2xf32>, vector<8x2xf32> -> vector<8x2xf32>
    %c0_63 = arith.constant 0 : index
    %c0_64 = arith.constant 0 : index
    %83 = vector.load %arg21[%c0_63, %c0_64] : memref<1x2xf32, #tpu.memory_space<vmem>>, vector<1x2xf32>
    %84 = vector.broadcast %83 : vector<1x2xf32> to vector<8x2xf32>
    %85 = arith.addf %82, %84 : vector<8x2xf32>
    %cst_65 = arith.constant dense<0xFF800000> : vector<8xf32>
    %86 = vector.multi_reduction <maximumf>, %85, %cst_65 [1] : vector<8x2xf32> to vector<8xf32>
    %87 = vector.shape_cast %86 : vector<8xf32> to vector<8x1xf32>
    %88 = vector.broadcast %87 : vector<8x1xf32> to vector<8x2xf32>
    %89 = arith.subf %85, %88 : vector<8x2xf32>
    %90 = math.exp %89 : vector<8x2xf32>
    %cst_66 = arith.constant dense<0.000000e+00> : vector<8xf32>
    %91 = vector.multi_reduction <add>, %90, %cst_66 [1] : vector<8x2xf32> to vector<8xf32>
    %92 = vector.shape_cast %91 : vector<8xf32> to vector<8x1xf32>
    %93 = tpu.reciprocal %92 : vector<8x1xf32> -> vector<8x1xf32>
    %94 = vector.broadcast %93 : vector<8x1xf32> to vector<8x2xf32>
    %95 = arith.mulf %90, %94 : vector<8x2xf32>
    %c0_67 = arith.constant 0 : index
    %c3 = arith.constant 3 : index
    %96 = vector.load %arg23[%c0_67, %c3] : memref<8x8xf32, #tpu.memory_space<vmem>>, vector<8x2xf32>
    tpu.vector_store %arg23[%c0_67, %c3], %95 {strides = array<i32>} : memref<8x8xf32, #tpu.memory_space<vmem>>, vector<8x2xf32>,
    return
  }
  func.func @transform_0(%arg0: i32) -> (i32, i32) {
    %c0_i32 = arith.constant 0 : i32
    %c0_i32_0 = arith.constant 0 : i32
    return %arg0, %c0_i32 : i32, i32
  }
  func.func @transform_1(%arg0: i32) -> (i32, i32) {
    %c0_i32 = arith.constant 0 : i32
    %c0_i32_0 = arith.constant 0 : i32
    %c0_i32_1 = arith.constant 0 : i32
    return %c0_i32, %c0_i32_0 : i32, i32
  }
  func.func @transform_2(%arg0: i32) -> (i32, i32) {
    %c0_i32 = arith.constant 0 : i32
    %c0_i32_0 = arith.constant 0 : i32
    %c0_i32_1 = arith.constant 0 : i32
    return %c0_i32, %c0_i32_0 : i32, i32
  }
  func.func @transform_3(%arg0: i32) -> (i32, i32) {
    %c0_i32 = arith.constant 0 : i32
    %c0_i32_0 = arith.constant 0 : i32
    %c0_i32_1 = arith.constant 0 : i32
    return %c0_i32, %c0_i32_0 : i32, i32
  }
  func.func @transform_4(%arg0: i32) -> (i32, i32) {
    %c0_i32 = arith.constant 0 : i32
    %c0_i32_0 = arith.constant 0 : i32
    %c0_i32_1 = arith.constant 0 : i32
    return %c0_i32, %c0_i32_0 : i32, i32
  }
  func.func @transform_5(%arg0: i32) -> (i32, i32) {
    %c0_i32 = arith.constant 0 : i32
    %c0_i32_0 = arith.constant 0 : i32
    %c0_i32_1 = arith.constant 0 : i32
    return %c0_i32, %c0_i32_0 : i32, i32
  }
  func.func @transform_6(%arg0: i32) -> (i32, i32) {
    %c0_i32 = arith.constant 0 : i32
    %c0_i32_0 = arith.constant 0 : i32
    %c0_i32_1 = arith.constant 0 : i32
    return %c0_i32, %c0_i32_0 : i32, i32
  }
  func.func @transform_7(%arg0: i32) -> (i32, i32) {
    %c0_i32 = arith.constant 0 : i32
    %c0_i32_0 = arith.constant 0 : i32
    %c0_i32_1 = arith.constant 0 : i32
    return %c0_i32, %c0_i32_0 : i32, i32
  }
  func.func @transform_8(%arg0: i32) -> (i32, i32) {
    %c0_i32 = arith.constant 0 : i32
    %c0_i32_0 = arith.constant 0 : i32
    %c0_i32_1 = arith.constant 0 : i32
    return %c0_i32, %c0_i32_0 : i32, i32
  }
  func.func @transform_9(%arg0: i32) -> (i32, i32) {
    %c0_i32 = arith.constant 0 : i32
    %c0_i32_0 = arith.constant 0 : i32
    %c0_i32_1 = arith.constant 0 : i32
    return %c0_i32, %c0_i32_0 : i32, i32
  }
  func.func @transform_10(%arg0: i32) -> (i32, i32) {
    %c0_i32 = arith.constant 0 : i32
    %c0_i32_0 = arith.constant 0 : i32
    %c0_i32_1 = arith.constant 0 : i32
    return %c0_i32, %c0_i32_0 : i32, i32
  }
  func.func @transform_11(%arg0: i32) -> (i32, i32) {
    %c0_i32 = arith.constant 0 : i32
    %c0_i32_0 = arith.constant 0 : i32
    %c0_i32_1 = arith.constant 0 : i32
    return %c0_i32, %c0_i32_0 : i32, i32
  }
  func.func @transform_12(%arg0: i32) -> (i32, i32) {
    %c0_i32 = arith.constant 0 : i32
    %c0_i32_0 = arith.constant 0 : i32
    %c0_i32_1 = arith.constant 0 : i32
    return %c0_i32, %c0_i32_0 : i32, i32
  }
  func.func @transform_13(%arg0: i32) -> (i32, i32) {
    %c0_i32 = arith.constant 0 : i32
    %c0_i32_0 = arith.constant 0 : i32
    %c0_i32_1 = arith.constant 0 : i32
    return %c0_i32, %c0_i32_0 : i32, i32
  }
  func.func @transform_14(%arg0: i32) -> (i32, i32) {
    %c0_i32 = arith.constant 0 : i32
    %c0_i32_0 = arith.constant 0 : i32
    %c0_i32_1 = arith.constant 0 : i32
    return %c0_i32, %c0_i32_0 : i32, i32
  }
  func.func @transform_15(%arg0: i32) -> (i32, i32) {
    %c0_i32 = arith.constant 0 : i32
    %c0_i32_0 = arith.constant 0 : i32
    %c0_i32_1 = arith.constant 0 : i32
    return %c0_i32, %c0_i32_0 : i32, i32
  }
  func.func @transform_16(%arg0: i32) -> (i32, i32) {
    %c0_i32 = arith.constant 0 : i32
    %c0_i32_0 = arith.constant 0 : i32
    %c0_i32_1 = arith.constant 0 : i32
    return %c0_i32, %c0_i32_0 : i32, i32
  }
  func.func @transform_17(%arg0: i32) -> (i32, i32) {
    %c0_i32 = arith.constant 0 : i32
    %c0_i32_0 = arith.constant 0 : i32
    %c0_i32_1 = arith.constant 0 : i32
    return %c0_i32, %c0_i32_0 : i32, i32
  }
  func.func @transform_18(%arg0: i32) -> (i32, i32) {
    %c0_i32 = arith.constant 0 : i32
    %c0_i32_0 = arith.constant 0 : i32
    %c0_i32_1 = arith.constant 0 : i32
    return %c0_i32, %c0_i32_0 : i32, i32
  }
  func.func @transform_19(%arg0: i32) -> (i32, i32) {
    %c0_i32 = arith.constant 0 : i32
    %c0_i32_0 = arith.constant 0 : i32
    %c0_i32_1 = arith.constant 0 : i32
    return %c0_i32, %c0_i32_0 : i32, i32
  }
  func.func @transform_20(%arg0: i32) -> (i32, i32) {
    %c0_i32 = arith.constant 0 : i32
    %c0_i32_0 = arith.constant 0 : i32
    %c0_i32_1 = arith.constant 0 : i32
    return %c0_i32, %c0_i32_0 : i32, i32
  }
  func.func @transform_21(%arg0: i32) -> (i32, i32) {
    %c0_i32 = arith.constant 0 : i32
    %c0_i32_0 = arith.constant 0 : i32
    return %arg0, %c0_i32 : i32, i32
  }
  func.func @transform_22(%arg0: i32) -> (i32, i32) {
    %c0_i32 = arith.constant 0 : i32
    %c0_i32_0 = arith.constant 0 : i32
    return %arg0, %c0_i32 : i32, i32
  }
}

</mosaic_0001>

<bundles_post_ra>
// kernel: tpu_custom_call.1
= control target key start
LH: loop header
LB: loop body
LE: loop exit
PB: predicated region body
PF: predicated region fallthrough
CT: control target
= control target key end

     0   :  { %s1842_s0 = inlined_call_operand.vmem [shape: f32[8,128], index: 0, kind: input, shape index: {}]   ;;  %s1843_s1 = inlined_call_operand.vmem [shape: f32[128,60], index: 1, kind: input, shape index: {}]   ;;  %s1844_s2 = inlined_call_operand.vmem [shape: f32[1,60], index: 2, kind: input, shape index: {}]   ;;  %s1845_s3 = inlined_call_operand.vmem [shape: f32[60,30], index: 3, kind: input, shape index: {}]   ;;  %s1846_s4 = inlined_call_operand.vmem [shape: f32[1,30], index: 4, kind: input, shape index: {}]   ;;  %s1847_s5 = inlined_call_operand.vmem [shape: f32[30,10], index: 5, kind: input, shape index: {}]   ;;  %s1848_s6 = inlined_call_operand.vmem [shape: f32[1,10], index: 6, kind: input, shape index: {}]   ;;  %s1849_s7 = inlined_call_operand.vmem [shape: f32[10,1], index: 7, kind: input, shape index: {}]   ;;  %s1850_s8 = inlined_call_operand.<no memory space> [shape: f32[1,1], index: 8, kind: input, shape index: {}]   ;;  %s1851_s9 = inlined_call_operand.vmem [shape: f32[1,10], index: 9, kind: input, shape index: {}]   ;;  %s1852_s10 = inlined_call_operand.vmem [shape: f32[1,10], index: 10, kind: input, shape index: {}]   ;;  %s1853_s11 = inlined_call_operand.vmem [shape: f32[10,30], index: 11, kind: input, shape index: {}]   ;;  %s1854_s12 = inlined_call_operand.vmem [shape: f32[1,30], index: 12, kind: input, shape index: {}]   ;;  %s1855_s13 = inlined_call_operand.vmem [shape: f32[30,60], index: 13, kind: input, shape index: {}]   ;;  %s1856_s14 = inlined_call_operand.vmem [shape: f32[1,60], index: 14, kind: input, shape index: {}]   ;;  %s1857_s15 = inlined_call_operand.vmem [shape: f32[60,128], index: 15, kind: input, shape index: {}]   ;;  %s1858_s16 = inlined_call_operand.vmem [shape: f32[1,128], index: 16, kind: input, shape index: {}]   ;;  %s1859_s17 = inlined_call_operand.vmem [shape: f32[3,10], index: 17, kind: input, shape index: {}]   ;;  %s1860_s18 = inlined_call_operand.vmem [shape: f32[1,10], index: 18, kind: input, shape index: {}]   ;;  %s1861_s19 = inlined_call_operand.vmem [shape: f32[10,2], index: 19, kind: input, shape index: {}]   ;;  %s1862_s20 = inlined_call_operand.vmem [shape: f32[1,2], index: 20, kind: input, shape index: {}]   ;;  %s1863_s21 = inlined_call_operand.hbm [shape: f32[8,128], index: 21, kind: output, shape index: {0}]   ;;  %s1864_s22 = inlined_call_operand.hbm [shape: f32[8,8], index: 22, kind: output, shape index: {1}]  }
   0x1   :  { %1868 = sst [smem:[#allocation9_spill]] %s1842_s0  ;;  %v28_v0 = vstv %s1850_s8 }
   0x2   :  { %1869 = sst [smem:[#allocation10_spill]] %s1843_s1  ;;  %29 = vst [vmem:[#allocation2] sm:$0x1] %v28_v0 }
   0x3   :  { %1870 = sst [smem:[#allocation11_spill]] %s1844_s2 }
   0x4   :  { %1871 = sst [smem:[#allocation12_spill]] %s1845_s3 }
   0x5   :  { %1872 = sst [smem:[#allocation13_spill]] %s1846_s4 }
   0x6   :  { %1873 = sst [smem:[#allocation14_spill]] %s1847_s5 }
   0x7   :  { %1874 = sst [smem:[#allocation15_spill]] %s1848_s6 }
   0x8   :  { %30 = vsyncpa [#allocation4], 0  ;;  %s1875_s4 = sld [smem:[#allocation10_spill]]  ;;  %v1430_v4 = vmov 0.0|0.0   ;;  %vm1431_vm0 = vmmov 0   ;;  %v1432_v7 = vmov 0.0  }
   0x9   :  { %1271 = vmatprep.subr.bf16.mxu0 %v1430_v4  ;;  %1177 = vmatprep.mubr.msk.f32.mxu0 %vm1431_vm0, %v1432_v7  ;;  %s1876_s28 = sld [smem:[#allocation12_spill]] }
   0xa   :  { %1295 = vmatprep.subr.bf16.mxu1 %v1430_v4  ;;  %1196 = vmatprep.mubr.msk.f32.mxu1 %vm1431_vm0, %v1432_v7 }
   0xe   :  { %v75_v1 = vld [vmem:[%s1875_s4] sm:$0xff]  ;;  %v76_v2 = vld [vmem:[%s1875_s4 + $0x8] sm:$0xff]  ;;  %v77_v3 = vld [vmem:[%s1875_s4 + $0x10] sm:$0xff] }
   0xf   :  { %v1272_v5 = vpack.c.bf16 %v76_v2, %v75_v1  ;;  %v78_v6 = vld [vmem:[%s1875_s4 + $0x18] sm:$0xff]  ;;  %v79_v9 = vld [vmem:[%s1875_s4 + $0x20] sm:$0xff]  ;;  %v80_v10 = vld [vmem:[%s1875_s4 + $0x28] sm:$0xff] }
  0x10   :  { %v1275_v8 = vpack.c.bf16 %v78_v6, %v77_v3  ;;  %v169_v11 = vld [vmem:[%s1876_s28] sm:$0xff]  ;;  %v170_v12 = vld [vmem:[%s1876_s28 + $0x8] sm:$0xff] }
  0x11   :  { %1273 = vmatpush3.bf16.msra.mxu0 %v1272_v5 }
  0x12   :  { %1274 = vmatprep.subr.bf16.mxu0 %v1430_v4 }
  0x13   :  { %31 = vsyncpa [#allocation6], 0  ;;  %v1278_v13 = vpack.c.bf16 %v80_v10, %v79_v9  ;;  %v1296_v14 = vpack.c.bf16 %v170_v12, %v169_v11  ;;  %v81_v15 = vld [vmem:[%s1875_s4 + $0x30] sm:$0xff]  ;;  %v82_v16 = vld [vmem:[%s1875_s4 + $0x38] sm:$0xff]  ;;  %s1877_s26 = sld [smem:[#allocation9_spill]]  ;;  %vm188_vm1 = vcmask 1043456  }
  0x14   :  { %v1281_v17 = vpack.c.bf16 %v82_v16, %v81_v15  ;;  %v83_v18 = vld [vmem:[%s1875_s4 + $0x40] sm:$0xff]  ;;  %v84_v19 = vld [vmem:[%s1875_s4 + $0x48] sm:$0xff]  ;;  %v85_v21 = vld [vmem:[%s1875_s4 + $0x50] sm:$0xff]  ;;  %vm1433_vm2 = vmmov 1   ;;  %vm184_vm4 = vcmask 490496   ;;  %s1881_s27 = sld [smem:[#allocation14_spill]] }
  0x15   :  { %1276 = vmatpush3.bf16.msra.mxu0 %v1275_v8  ;;  %1297 = vmatpush3.bf16.msra.mxu1 %v1296_v14  ;;  %v1284_v20 = vpack.c.bf16 %v84_v19, %v83_v18  ;;  %v86_v22 = vld [vmem:[%s1875_s4 + $0x58] sm:$0xff]  ;;  %v87_v24 = vld [vmem:[%s1875_s4 + $0x60] sm:$0xff]  ;;  %v88_v25 = vld [vmem:[%s1875_s4 + $0x68] sm:$0xff]  ;;  %vm278_vm5 = vcmask 1045504   ;;  %s1884_s24 = sld [smem:[#allocation13_spill]]  ;;  %vm274_vm7 = vcmask 244736  }
  0x16   :  { %1277 = vmatprep.subr.bf16.mxu0 %v1430_v4  ;;  %1298 = vmatprep.subr.bf16.mxu1 %v1430_v4  ;;  %v1287_v23 = vpack.c.bf16 %v86_v22, %v85_v21  ;;  %v1290_v26 = vpack.c.bf16 %v88_v25, %v87_v24  ;;  %v89_v27 = vld [vmem:[%s1875_s4 + $0x70] sm:$0xff]  ;;  %v90_v28 = vld [vmem:[%s1875_s4 + $0x78] sm:$0xff]  ;;  %v173_v34 = vld [vmem:[%s1876_s28 + $0x20] sm:$0xff]  ;;  %vm366_vm8 = vcmask 1041408   ;;  %vm362_vm10 = vcmask 80896  }
  0x17   :  { %v1293_v29 = vpack.c.bf16 %v90_v28, %v89_v27  ;;  %v171_v31 = vld [vmem:[%s1876_s28 + $0x10] sm:$0xff]  ;;  %v172_v32 = vld [vmem:[%s1876_s28 + $0x18] sm:$0xff]  ;;  %v174_v35 = vld [vmem:[%s1876_s28 + $0x28] sm:$0xff]  ;;  %vm452_vm11 = vcmask 1040384   ;;  %vm448_vm12 = vcmask 7168   ;;  %vm853_vm13 = vcmask 1042432  }
  0x18   :  { %v1299_v33 = vpack.c.bf16 %v172_v32, %v171_v31  ;;  %v1302_v36 = vpack.c.bf16 %v174_v35, %v173_v34  ;;  %v175_v37 = vld [vmem:[%s1876_s28 + $0x30] sm:$0xff]  ;;  %v176_v38 = vld [vmem:[%s1876_s28 + $0x38] sm:$0xf]  ;;  %vm1653_vm3 = vmpackc.low %vm188_vm1, %vm1433_vm2 }
  0x19   :  { %1279 = vmatpush3.bf16.msra.mxu0 %v1278_v13  ;;  %v1626_v30 = vld [vmem:[%s1877_s26] sm:$0xff]  ;;  %v1305_v39 = vpack.c.bf16 %v176_v38, %v175_v37  ;;  %s1880_s26 = sld [smem:[#allocation11_spill]]  ;;  %vm1680_vm6 = vmpackc.low %vm278_vm5, %vm1433_vm2  ;;  %v354_v59 = vld [vmem:[%s1849_s7 + $0x8] sm:$0x3]  ;;  %vm834_vm5 = vcmask 15368  }
  0x1a   :  { %1280 = vmatprep.subr.bf16.mxu0 %v1430_v4  ;;  %1300 = vmatpush3.bf16.msra.mxu1 %v1299_v33  ;;  %v263_v46 = vld [vmem:[%s1881_s27] sm:$0xff]  ;;  %v264_v47 = vld [vmem:[%s1881_s27 + $0x8] sm:$0xff]  ;;  %v265_v48 = vld [vmem:[%s1881_s27 + $0x10] sm:$0xff] }
  0x1b   :  { %1301 = vmatprep.subr.bf16.mxu1 %v1430_v4  ;;  %v1309_v49 = vpack.c.bf16 %v264_v47, %v263_v46  ;;  %v266_v50 = vld [vmem:[%s1881_s27 + $0x18] sm:$0x3f]  ;;  %v1060_v53 = vld [vmem:[%s1884_s24] ss:$0 sm:$0xff]  ;;  %vm1700_vm9 = vmpackc.low %vm366_vm8, %vm1433_vm2  ;;  %s1887_s27 = sld [smem:[#allocation15_spill]]  ;;  %vm849_vm8 = vcmask 23552  }
  0x1c   :  { %v1312_v51 = vpack.c.bf16 %v266_v50, %v265_v48  ;;  %v353_v58 = vld [vmem:[%s1849_s7] sm:$0xff]  ;;  %v528_v11 = vld [vmem:[%s1853_s11 + $0x8] sm:$0x3]  ;;  %v616_v22 = vld [vmem:[%s1855_s13 + $0x18] sm:$0x3f] }
  0x1d   :  { %1282 = vmatpush3.bf16.msra.mxu0 %v1281_v17  ;;  %v1316_v60 = vpack.c.bf16 %v354_v59, %v353_v58  ;;  %v440_v2 = vld [vmem:[%s1851_s9] sm:$0x1]  ;;  %v614_v19 = vld [vmem:[%s1855_s13 + $0x8] sm:$0xff]  ;;  %v703_v33 = vld [vmem:[%s1857_s15 + $0x10] sm:$0xff] }
  0x1e   :  { %1283 = vmatprep.subr.bf16.mxu0 %v1430_v4  ;;  %1303 = vmatpush3.bf16.msra.mxu1 %v1302_v36  ;;  %v1066_v5 = vld [vmem:[#allocation2] ss:$0 sm:$0xff]  ;;  %v702_v25 = vld [vmem:[%s1857_s15 + $0x8] sm:$0xff]  ;;  %v704_v34 = vld [vmem:[%s1857_s15 + $0x18] sm:$0xff] }
  0x1f   :  { %1304 = vmatprep.subr.bf16.mxu1 %v1430_v4  ;;  %v1059_v41 = vld [vmem:[%s1880_s26] ss:$0 sm:$0xff]  ;;  %v1334_v35 = vpack.c.bf16 %v704_v34, %v703_v33  ;;  %v706_v37 = vld [vmem:[%s1857_s15 + $0x28] sm:$0xff] }
  0x20   :  { %v527_v10 = vld [vmem:[%s1853_s11] sm:$0xff] }
  0x21   :  { %1285 = vmatpush3.bf16.msra.mxu0 %v1284_v20  ;;  %v1063_v62 = vld [vmem:[%s1887_s27] ss:$0 sm:$0xff]  ;;  %v1320_v12 = vpack.c.bf16 %v528_v11, %v527_v10  ;;  %v615_v20 = vld [vmem:[%s1855_s13 + $0x10] sm:$0xff] }
  0x22   :  { %1286 = vmatprep.subr.bf16.mxu0 %v1430_v4  ;;  %1307 = vmatpush3.bf16.msk.msra.mxu1 %vm1653_vm3, %v1305_v39  ;;  %v1069_v13 = vld [vmem:[%s1852_s10] ss:$0 sm:$0xff]  ;;  %v707_v39 = vld [vmem:[%s1857_s15 + $0x30] sm:$0xff] }
  0x23   :  { %1308 = vmatprep.subr.bf16.mxu1 %v1430_v4  ;;  %v613_v18 = vld [vmem:[%s1855_s13] sm:$0xff] }
  0x24   :  { %v1324_v21 = vpack.c.bf16 %v614_v19, %v613_v18  ;;  %v701_v24 = vld [vmem:[%s1857_s15] sm:$0xff] }
  0x25   :  { %1288 = vmatpush3.bf16.msra.mxu0 %v1287_v23  ;;  %v1327_v23 = vpack.c.bf16 %v616_v22, %v615_v20  ;;  %v1072_v27 = vld [vmem:[%s1854_s12] ss:$0 sm:$0xff] }
  0x26   :  { %1289 = vmatprep.subr.bf16.mxu0 %v1430_v4  ;;  %v705_v36 = vld [vmem:[%s1857_s15 + $0x20] sm:$0xff] }
  0x27   :  { %v1337_v38 = vpack.c.bf16 %v706_v37, %v705_v36  ;;  %v1078_v40 = vld [vmem:[%s1858_s16] ss:$0 sm:$0xff] }
  0x28   :  { %v928_v20 = vld [vmem:[%s1861_s19] sm:$0xff] }
  0x29   :  { %1291 = vmatpush3.bf16.msra.mxu0 %v1290_v26  ;;  %v1331_v26 = vpack.c.bf16 %v702_v25, %v701_v24 }
  0x2a   :  { %1292 = vmatprep.subr.bf16.mxu0 %v1430_v4 }
  0x2d   :  { %1294 = vmatpush3.bf16.msra.mxu0 %v1293_v29 }
  0x2e   :  { %1319 = vmatprep.subr.bf16.mxu0 %v1430_v4 }
  0x30   :  { %1178 = vmatmul.mubr.f32.vlgmr.msra.gmra.mrb[0].mxu0 %v1626_v30 }
  0x31   :  { %1226 = vmatprep.mubr.msk.f32.mxu0 %vm1431_vm0, %v1432_v7  ;;  %1322 = vmatpush3.bf16.msk.msra.mxu0 %vm1700_vm9, %v1320_v12 }
  0x32   :  { %1330 = vmatprep.subr.bf16.mxu0 %v1430_v4 }
 0x103   :  { %v164_v42 = vpop.f32.mrb[0].mxu0 }
 0x104   :  { %v165_v43 = vadd.f32 %v1059_v41, %v164_v42  ;;  %v1179_v44 = vpop.f32.mrb[1].mxu0  ;;  %v708_v41 = vld [vmem:[%s1857_s15 + $0x38] sm:$0xf] }
 0x105   :  { %v1340_v42 = vpack.c.bf16 %v708_v41, %v707_v39  ;;  %v1075_v44 = vld [vmem:[%s1856_s14] ss:$0 sm:$0xff] }
 0x106   :  { %1354 = vtanh.f32 %v165_v43  ;;  %v796_v43 = vmul.f32 %v1626_v30, %v1626_v30 }
 0x108   :  { %797 = vadd.xlane.f32.xlu0 %v796_v43 }
 0x110   :  { %v1355_v45 = vpop.eup %1354 }
 0x111   :  { %1197 = vmatmul.mubr.msk.f32.vlgmr.msra.gmra.mrb[0].mxu1 %vm184_vm4, %v1355_v45 }
 0x112   :  { %1207 = vmatprep.mubr.msk.f32.mxu1 %vm1431_vm0, %v1432_v7  ;;  %1310 = vmatpush3.bf16.msra.mxu1 %v1309_v49 }
 0x113   :  { %1311 = vmatprep.subr.bf16.mxu1 %v1430_v4 }
 0x116   :  { %1314 = vmatpush3.bf16.msk.msra.mxu1 %vm1680_vm6, %v1312_v51 }
 0x117   :  { %1315 = vmatprep.subr.bf16.mxu1 %v1430_v4 }
 0x1e4   :  { %v258_v54 = vpop.f32.mrb[0].mxu1 }
 0x1e5   :  { %v259_v55 = vadd.f32 %v1060_v53, %v258_v54  ;;  %v1198_v56 = vpop.f32.mrb[1].mxu1 }
 0x1e6   :  { %v841_v56 = vld [vmem:[%s1859_s17] sm:$0x7] }
 0x1e7   :  { %1356 = vtanh.f32 %v259_v55 }
 0x1f1   :  { %v1357_v57 = vpop.eup %1356 }
 0x1f2   :  { %1208 = vmatmul.mubr.msk.f32.vlgmr.msra.gmra.mrb[2].mxu1 %vm274_vm7, %v1357_v57  ;;  %v798_v57 = vpop.xlane.xlu0 %797 }
 0x1f3   :  { %1214 = vmatprep.mubr.msk.f32.mxu1 %vm1431_vm0, %v1432_v7  ;;  %1318 = vmatpush3.bf16.msk.msra.mxu1 %vm1700_vm9, %v1316_v60  ;;  %vm801_vm14 = vcmp.eq.f32.partialorder %v798_v57, inf  ;;  %v804_v60 = vand.u32 2147483648, %v798_v57  ;;  %vm803_vm15 = vcmp.eq.f32.partialorder %v798_v57, 0.0 }
 0x1f4   :  { %1217 = vmatprep.subr.mxu1 %v1432_v7 }
 0x2c5   :  { %v348_v63 = vpop.f32.mrb[2].mxu1 }
 0x2c6   :  { %v349_v0 = vadd.f32 %v1063_v62, %v348_v63  ;;  %v1209_v1 = vpop.f32.mrb[3].mxu1 }
 0x2c8   :  { %1358 = vtanh.f32 %v349_v0 }
 0x2d2   :  { %v1359_v3 = vpop.eup %1358 }
 0x2d3   :  { %1215 = vmatmul.mubr.msk.f32.vlgmr.msra.gmra.mrb[4].mxu1 %vm362_vm10, %v1359_v3 }
 0x2d4   :  { %1218 = vmatpush3.msk.msra.mxu1 %vm452_vm11, %v440_v2  ;;  %1219 = vmatprep.mubr.msk.f32.mxu1 %vm1431_vm0, %v1432_v7 }
 0x2d5   :  { %1323 = vmatprep.subr.bf16.mxu1 %v1430_v4 }
 0x3a6   :  { %v436_v6 = vpop.f32.mrb[4].mxu1 }
 0x3a7   :  { %v437_v8 = vadd.f32 %v1066_v5, %v436_v6  ;;  %v1216_v9 = vpop.f32.mrb[5].mxu1 }
 0x3a9   :  { %833 = vst.msk [vmem:[#allocation5] sm:$0xff] %vm448_vm12, %v437_v8  ;;  %1220 = vmatmul.mubr.msk.f32.vlgmr.msra.gmra.mrb[6].mxu1 %vm448_vm12, %v437_v8 }
 0x3aa   :  { %1237 = vmatprep.mubr.msk.f32.mxu1 %vm1431_vm0, %v1432_v7  ;;  %1325 = vmatpush3.bf16.msra.mxu1 %v1324_v21  ;;  %v929_v21 = vld [vmem:[%s1861_s19 + $0x8] sm:$0x3] }
 0x3ab   :  { %1326 = vmatprep.subr.bf16.mxu1 %v1430_v4  ;;  %v1344_v22 = vpack.c.bf16 %v929_v21, %v928_v20 }
 0x3ae   :  { %1329 = vmatpush3.bf16.msk.msra.mxu1 %vm1680_vm6, %v1327_v23  ;;  %vm836_vm6 = vcmask 23568   ;;  %v1081_v23 = vld [vmem:[%s1860_s18] ss:$0 sm:$0xff]  ;;  %s1434_s18 = smov [#allocation3]  }
 0x3af   :  { %1259 = vmatprep.subr.mxu1 %v1432_v7  ;;  %s1037_s19 = sshll.u32 %s1434_s18, 4  ;;  %s1038_s19 = int_to_ptr.vmem [resolvable:$true] %s1037_s19 }
 0x3b0   :  { %s1382_s4 = scalar_lea.vmem %s1038_s19, 128  ;;  %p1387_p1 = scmp.lt.s32.totalorder %s1038_s19, %s1038_s19 }
 0x3b1   :  { %p1383_p0 = scmp.ne.s32.totalorder %s1038_s19, %s1382_s4  ;;  %p1388_p2 = scmp.lt.s32.totalorder %s1382_s4, %s1382_s4 }
 0x3b3   :  { %p1389_p3 = por %p1388_p2, %p1387_p1 }
 0x3b5   :  { %p1390_p4 = pnand %p1389_p3, %p1383_p0 }
 0x47c   :  { %v522_v14 = vpop.f32.mrb[6].mxu1 }
 0x47d   :  { %v523_v15 = vadd.f32 %v1069_v13, %v522_v14  ;;  %v1221_v16 = vpop.f32.mrb[7].mxu1 }
 0x47f   :  { %1360 = vtanh.f32 %v523_v15 }
 0x489   :  { %v1361_v17 = vpop.eup %1360 }
 0x48a   :  { %1227 = vmatmul.mubr.msk.f32.vlgmr.msra.gmra.mrb[2].mxu0 %vm362_vm10, %v1361_v17 }
 0x48b   :  { %1256 = vmatprep.mubr.msk.f32.mxu0 %vm1431_vm0, %v1432_v7  ;;  %1332 = vmatpush3.bf16.msra.mxu0 %v1331_v26 }
 0x48c   :  { %1333 = vmatprep.subr.bf16.mxu0 %v1430_v4 }
 0x48f   :  { %1335 = vmatpush3.bf16.msra.mxu0 %v1334_v35 }
 0x490   :  { %1336 = vmatprep.subr.bf16.mxu0 %v1430_v4 }
 0x493   :  { %1338 = vmatpush3.bf16.msra.mxu0 %v1337_v38 }
 0x494   :  { %1339 = vmatprep.subr.bf16.mxu0 %v1430_v4 }
 0x497   :  { %1342 = vmatpush3.bf16.msk.msra.mxu0 %vm1653_vm3, %v1340_v42 }
 0x55d   :  { %v608_v28 = vpop.f32.mrb[2].mxu0 }
 0x55e   :  { %v609_v29 = vadd.f32 %v1072_v27, %v608_v28  ;;  %v1228_v31 = vpop.f32.mrb[3].mxu0  ;;  %v1084_v27 = vld [vmem:[%s1862_s20] ss:$0 sm:$0xff] }
 0x560   :  { %1362 = vtanh.f32 %v609_v29 }
 0x56a   :  { %v1363_v32 = vpop.eup %1362 }
 0x56b   :  { %1238 = vmatmul.mubr.msk.f32.vlgmr.msra.gmra.mrb[8].mxu1 %vm274_vm7, %v1363_v32  ;;  %vm838_vm7 = vcmask 64552  }
 0x56c   :  { %1261 = vmatprep.mubr.msk.f32.mxu1 %vm1431_vm0, %v1432_v7  ;;  %1260 = vmatpush3.msk.msra.mxu1 %vm853_vm13, %v841_v56 }
 0x56d   :  { %1343 = vmatprep.subr.bf16.mxu1 %v1430_v4 }
 0x63e   :  { %v696_v45 = vpop.f32.mrb[8].mxu1 }
 0x63f   :  { %v697_v46 = vadd.f32 %v1075_v44, %v696_v45  ;;  %v1239_v47 = vpop.f32.mrb[9].mxu1 }
 0x641   :  { %1364 = vtanh.f32 %v697_v46 }
 0x642   :  { %1366 = vrsqrt.f32 %v798_v57 }
 0x64b   :  { %v1365_v48 = vpop.eup %1364 }
 0x64c   :  { %1257 = vmatmul.mubr.msk.f32.vlgmr.msra.gmra.mrb[4].mxu0 %vm184_vm4, %v1365_v48  ;;  %v1367_v58 = vpop.eup %1366 }
 0x64d   :  { %v800_v59 = vmul.f32 %v1367_v58, %v798_v57 }
 0x64f   :  { %v802_v63 = vsel %vm801_vm14, %v798_v57, %v800_v59 }
 0x650   :  { %v805_v0 = vsel %vm803_vm15, %v804_v60, %v802_v63 }
 0x71f   :  { %v788_v49 = vpop.f32.mrb[4].mxu0 }
 0x720   :  { %v789_v50 = vadd.f32 %v1078_v40, %v788_v49  ;;  %v1258_v51 = vpop.f32.mrb[5].mxu0 }
 0x722   :  { %792 = vst [vmem:[#allocation3] sm:$0xff] %v789_v50  ;;  %v806_v52 = vmul.f32 %v789_v50, %v789_v50  ;;  %v820_v53 = vsub.f32 %v1626_v30, %v789_v50  ;;  %v793_v55 = vmul.f32 %v789_v50, %v1626_v30 }
 0x724   :  { %807 = vadd.xlane.f32.xlu0 %v806_v52  ;;  %v821_v54 = vmul.f32 %v820_v53, %v820_v53 }
 0x726   :  { %822 = vadd.xlane.f32.xlu1 %v821_v54 }
 0x72a   :  { %794 = vadd.xlane.f32.xlu1 %v793_v55 }
 0x7b1   :  { %v808_v62 = vpop.xlane.xlu0 %807 }
 0x7b2   :  { %1368 = vrsqrt.f32 %v808_v62  ;;  %vm811_vm1 = vcmp.eq.f32.partialorder %v808_v62, inf  ;;  %v814_v5 = vand.u32 2147483648, %v808_v62  ;;  %vm813_vm2 = vcmp.eq.f32.partialorder %v808_v62, 0.0 }
 0x7b3   :  { %v823_v30 = vpop.xlane.xlu1 %822 }
 0x7b4   :  { %1370 = vrsqrt.f32 %v823_v30  ;;  %vm826_vm3 = vcmp.eq.f32.partialorder %v823_v30, inf  ;;  %v829_v8 = vand.u32 2147483648, %v823_v30  ;;  %vm828_vm4 = vcmp.eq.f32.partialorder %v823_v30, 0.0 }
 0x7b5   :  { %1372 = vrcp.f32 %v805_v0 }
 0x7b7   :  { %v795_v17 = vpop.xlane.xlu1 %794 }
 0x7bc   :  { %v1369_v1 = vpop.eup %1368 }
 0x7bd   :  { %v810_v2 = vmul.f32 %v1369_v1, %v808_v62 }
 0x7be   :  { %v1371_v3 = vpop.eup %1370 }
 0x7bf   :  { %v812_v4 = vsel %vm811_vm1, %v808_v62, %v810_v2  ;;  %v825_v6 = vmul.f32 %v1371_v3, %v823_v30  ;;  %v1373_v12 = vpop.eup %1372 }
 0x7c0   :  { %v815_v9 = vsel %vm813_vm2, %v814_v5, %v812_v4 }
 0x7c1   :  { %v827_v10 = vsel %vm826_vm3, %v823_v30, %v825_v6  ;;  %v816_v11 = vmul.f32 %v815_v9, %v805_v0 }
 0x7c2   :  { %v830_v13 = vsel %vm828_vm4, %v829_v8, %v827_v10 }
 0x7c3   :  { %v817_v14 = vmax.f32 %v816_v11, 1e-08  ;;  %v832_v15 = vmul.f32 %v1373_v12, %v830_v13 }
 0x7c5   :  { %1374 = vrcp.f32 %v817_v14  ;;  %835 = vst.msk [vmem:[#allocation5] sm:$0xff] %vm834_vm5, %v832_v15 }
 0x7cf   :  { %v1375_v16 = vpop.eup %1374 }
 0x7d0   :  { %v819_v18 = vmul.f32 %v1375_v16, %v795_v17 }
 0x7d2   :  { %837 = vst.msk [vmem:[#allocation5] sm:$0xff] %vm836_vm6, %v819_v18 }
 0x7d3   :  { %839 = vst.msk [vmem:[#allocation5] sm:$0xff] %vm838_vm7, %v1432_v7 }
 0x7da   :  { %v840_v19 = vld [vmem:[#allocation5] sm:$0xff] }
 0x7db   :  { %1262 = vmatmul.mubr.msk.f32.vlgmr.msra.gmra.mrb[10].mxu1 %vm849_vm8, %v840_v19 }
 0x7dc   :  { %1268 = vmatprep.mubr.msk.f32.mxu1 %vm1431_vm0, %v1432_v7  ;;  %1346 = vmatpush3.bf16.msk.msra.mxu1 %vm1700_vm9, %v1344_v22  ;;  %vm1013_vm0 = vcmask 15360  }
 0x8ae   :  { %v923_v24 = vpop.f32.mrb[10].mxu1 }
 0x8af   :  { %v924_v25 = vadd.f32 %v1081_v23, %v923_v24  ;;  %v1263_v26 = vpop.f32.mrb[11].mxu1 }
 0x8b1   :  { %1376 = vtanh.f32 %v924_v25 }
 0x8bb   :  { %v1377_v7 = vpop.eup %1376 }
 0x8bc   :  { %1269 = vmatmul.mubr.msk.f32.vlgmr.msra.gmra.mrb[12].mxu1 %vm362_vm10, %v1377_v7 }
 0x98f   :  { %v1009_v28 = vpop.f32.mrb[12].mxu1 }
 0x990   :  { %v1010_v29 = vadd.f32 %v1084_v27, %v1009_v28  ;;  %v1270_v61 = vpop.f32.mrb[13].mxu1 }
 0x992   :  { %v1014_v31 = vsel %vm1013_vm0, %v1010_v29, -inf }
 0x993   :  { %1015 = vmax.xlane.f32.xlu0 %v1014_v31 }
 0xa20   :  { %v1016_v32 = vpop.xlane.xlu0 %1015 }
 0xa21   :  { %v1017_v33 = vsub.f32 %v1010_v29, %v1016_v32 }
 0xa23   :  { %v1018_v34 = vmul.f32 1.442695, %v1017_v33 }
 0xa25   :  { %1378 = vpow2.f32 %v1018_v34 }
 0xa2f   :  { %v1379_v35 = vpop.eup %1378 }
 0xa30   :  { %v1020_v36 = vsel %vm1013_vm0, %v1379_v35, 0.0 }
 0xa31   :  { %1021 = vadd.xlane.f32.xlu1 %v1020_v36 }
 0xabe   :  { %v1022_v37 = vpop.xlane.xlu1 %1021 }
 0xabf   :  { %1380 = vrcp.f32 %v1022_v37 }
 0xac0   :  { %1393 = shalt.err (!%p1390_p4)
}
 0xac1   :  { %s1394_s3 = scalar_lea.hbm %s1863_s21, 128 }
 0xac2   :  { %p1395_p5 = scmp.ne.s32.totalorder %s1863_s21, %s1394_s3  ;;  %p1398_p6 = scmp.lt.u32.totalorder %s1394_s3, %s1863_s21 }
 0xac4   :  { %p1400_p7 = pnand %p1398_p6, %p1395_p5 }
 0xac6   :  { %1403 = shalt.err (!%p1400_p7)
}
 0xac7   :  { %1040 = dma.vmem_to_hbm [thread:$0]  %s1038_s19, 128, %s1863_s21, [#allocation4]   ;;  %vm1029_vm9 = vcmask 39960  }
 0xac8   :  { %s1435_s1 = smov 3   ;;  %s1436_s5 = smov [#allocation5]  }
 0xac9   :  { %v1381_v38 = vpop.eup %1380  ;;  %s1047_s24 = sshll.u32 %s1436_s5, 4  ;;  %s1048_s24 = int_to_ptr.vmem [resolvable:$true] %s1047_s24 }
 0xaca   :  { %v1024_v39 = vmul.f32 %v1381_v38, %v1379_v35  ;;  %s1404_s8 = scalar_lea.vmem %s1048_s24, 128  ;;  %p1409_p9 = scmp.lt.s32.totalorder %s1048_s24, %s1048_s24 }
 0xacb   :  { %p1405_p8 = scmp.ne.s32.totalorder %s1048_s24, %s1404_s8  ;;  %p1410_p10 = scmp.lt.s32.totalorder %s1404_s8, %s1404_s8 }
 0xacc   :  { %1026 = vrot.lane.b32.xlu0 %v1024_v39, %s1435_s1 }
 0xacd   :  { %p1411_p11 = por %p1410_p10, %p1409_p9 }
 0xacf   :  { %p1412_p12 = pnand %p1411_p11, %p1405_p8 }
 0xb3e   :  { %v1027_v41 = vpop.permute.xlu0 %1026 }
 0xb3f   :  { %1030 = vst.msk [vmem:[#allocation5] sm:$0xff] %vm1029_vm9, %v1027_v41 }
 0xb40   :  { %1415 = shalt.err (!%p1412_p12)
}
 0xb41   :  { %s1416_s21 = scalar_lea.hbm %s1864_s22, 128 }
 0xb42   :  { %p1417_p13 = scmp.ne.s32.totalorder %s1864_s22, %s1416_s21  ;;  %p1420_p0 = scmp.lt.u32.totalorder %s1416_s21, %s1864_s22 }
 0xb44   :  { %p1422_p1 = pnand %p1420_p0, %p1417_p13 }
 0xb46   :  { %1425 = shalt.err (!%p1422_p1)
}
 0xb47   :  { %1050 = dma.vmem_to_hbm [thread:$0]  %s1048_s24, 128, %s1864_s22, [#allocation6]  }
 0xb48   :  { %1426 = dma.done.wait [#allocation4], 128  }
 0xb49   :  { %1427 = vsyncadd [#allocation4], 4294967168 }
 0xb4a   :  { %1428 = dma.done.wait [#allocation6], 128  }
 0xb4b   :  { %1429 = vsyncadd [#allocation6], 4294967168 }
 0xb4c   :  { %1057 = vsyncpa [#allocation4], 1 }
 0xb4d   :  { %1058 = vsyncpa [#allocation6], 1 }

</bundles_post_ra>
